<compile_context>
chip_gen: v7x
topology: tpu7x:2x2x1
jax: 0.10.0
libtpu: 0.0.40
codegen_flags: <defaults>
</compile_context>

<pallas_src>
import functools

import jax
import jax.numpy as jnp
from jax.experimental import pallas as pl
from jax.experimental.pallas import tpu as pltpu


# ----------------------------------------------------------------------------
# Generation-aware hardware queries (VMEM budget, TensorCore count).
# ----------------------------------------------------------------------------
def _query_vmem_capacity_bytes():
    try:
        info = pltpu.get_tpu_info()
        for attr in ("vmem_capacity_bytes", "vmem_size_bytes", "vmem_bytes"):
            v = getattr(info, attr, None)
            if v:
                return int(v)
    except Exception:
        pass
    return 64 * 1024 * 1024          # conservative fallback (v7x physical VMEM)


def _query_num_tensorcores():
    # TODO(synk): replace device_kind parsing with a proper query if/when
    # Pallas exposes TensorCores-per-device; heuristic: v4/v5p megacore and
    # v7x present 2 TensorCores per JAX device.
    try:
        kind = (jax.devices()[0].device_kind or "").lower()
        if any(tag in kind for tag in ("v4", "v5p", "v7", "7x")):
            return 2
    except Exception:
        pass
    return 1


_VMEM_CAPACITY_BYTES = _query_vmem_capacity_bytes()
# ~75% of physical VMEM: ~96 MiB on v5e/v6e (128 MiB parts), ~48 MiB on v7x.
_VMEM_BUDGET_BYTES = max(32 * 1024 * 1024, (_VMEM_CAPACITY_BYTES * 3) // 4)
_NUM_TENSORCORES = _query_num_tensorcores()
# Only pay the smaller-tile / >=2-block constraint when there are 2 TCs to feed.
_PREFER_MULTI_BLOCK = _NUM_TENSORCORES >= 2

_TILE_CANDIDATES = (1024, 512, 384, 256, 128)


def _round_up(x, m):
    return (x + m - 1) // m * m


def _pad2(a, rows, cols):
    pr, pc = rows - a.shape[0], cols - a.shape[1]
    if pr == 0 and pc == 0:
        return a
    return jnp.pad(a, ((0, pr), (0, pc)))


def _choose_tile(dim_pad, max_tile, prefer_multi_block):
    """Largest tile <= max_tile dividing dim_pad (multiple of 128).

    If prefer_multi_block (2-TensorCore parts), keep >=2 blocks on the axis so
    the parallel grid axis can shard across cores.
    """
    for cand in _TILE_CANDIDATES:
        if cand > max_tile or dim_pad % cand != 0:
            continue
        if prefer_multi_block and dim_pad > 128 and dim_pad // cand < 2:
            continue
        return cand
    return 128


# ----------------------------------------------------------------------------
# Kernel 1: fused  y = maybe_relu( x @ w_eff + shift )
#   - BN (eval mode) scale pre-folded into w_eff, bias + BN shift into shift
#   - x, w_eff are bf16 (MXU), accumulation + epilogue in f32
#   - full-K block: 2-D grid, no reduction axis, no scratch accumulator
# ----------------------------------------------------------------------------
def _linear_kernel(x_ref, w_ref, shift_ref, o_ref, *, apply_relu):
    y = jnp.dot(x_ref[...], w_ref[...], preferred_element_type=jnp.float32)
    y = y + shift_ref[...]
    if apply_relu:
        y = jnp.maximum(y, 0.0)
    o_ref[...] = y.astype(o_ref.dtype)


def linear_bias_act_padded(x_p, w_p, s_p, *, apply_relu, out_dtype):
    """maybe_relu( x_p @ w_p + s_p ) on already-padded 128-multiple operands.

    x_p: [Mp, Kp] bf16, w_p: [Kp, Np] bf16, s_p: [1, Np] f32 -> [Mp, Np]
    out_dtype (output stays padded so consecutive layers chain with zero glue).
    """
    Mp, Kp = x_p.shape
    Kw, Np_ = w_p.shape
    assert Kp == Kw and s_p.shape == (1, Np_)

    # TODO(synk): if Kp ever exceeds a few thousand, reintroduce a K reduction
    # grid axis with a VMEM accumulator instead of a full-K block.
    tm = _choose_tile(Mp, 512 if _PREFER_MULTI_BLOCK else 1024,
                      _PREFER_MULTI_BLOCK)
    tn = _choose_tile(Np_, 512, False)

    kernel = functools.partial(_linear_kernel, apply_relu=apply_relu)
    return pl.pallas_call(
        kernel,
        out_shape=jax.ShapeDtypeStruct((Mp, Np_), out_dtype),
        grid_spec=pltpu.PrefetchScalarGridSpec(
            num_scalar_prefetch=0,
            grid=(Mp // tm, Np_ // tn),
            in_specs=[
                pl.BlockSpec((tm, Kp), lambda i, j: (i, 0)),   # x (bf16)
                pl.BlockSpec((Kp, tn), lambda i, j: (0, j)),   # w_eff (bf16)
                pl.BlockSpec((1, tn), lambda i, j: (0, j)),    # fused shift
            ],
            out_specs=pl.BlockSpec((tm, tn), lambda i, j: (i, j)),
        ),
        compiler_params=pltpu.CompilerParams(
            dimension_semantics=("parallel", "parallel"),
            vmem_limit_bytes=_VMEM_BUDGET_BYTES),
    )(x_p, w_p, s_p)


def linear_bias_act(x, w, shift, *, apply_relu):
    """Unpadded convenience wrapper (pads, runs, slices back). Test helper."""
    M, K = x.shape
    Kw, N = w.shape
    assert K == Kw and shift.shape == (N,)
    Mp, Kp, Np_ = _round_up(M, 128), _round_up(K, 128), _round_up(N, 128)
    x_p = _pad2(x, Mp, Kp).astype(jnp.bfloat16)
    w_p = _pad2(w, Kp, Np_).astype(jnp.bfloat16)
    s_p = jnp.pad(shift.astype(jnp.float32), (0, Np_ - N)).reshape(1, Np_)
    out = linear_bias_act_padded(x_p, w_p, s_p, apply_relu=apply_relu,
                                 out_dtype=jnp.float32)
    return out[:M, :N]


# ----------------------------------------------------------------------------
# Kernel 2a: fully fused APPNP propagation (adj resident in VMEM, one copy).
#   All K steps in one pallas_call: adj is read from HBM exactly once into a
#   single-buffered VMEM scratch (no auto double-buffering waste).
# ----------------------------------------------------------------------------
def _appnp_fused_kernel(adj_hbm, h_ref, o_ref, adj_vmem, dma_sem, *, K, alpha):
    # TODO(synk): stream adj row-slabs and overlap the HBM->VMEM DMA with the
    # step-1 matmul instead of one bulk copy.
    cp = pltpu.make_async_copy(adj_hbm, adj_vmem, dma_sem)
    cp.start()
    h = h_ref[...]                      # f32 residual
    ah = alpha * h                      # hoisted out of the K loop
    x_b16 = h.astype(jnp.bfloat16)
    cp.wait()
    x = h
    for step in range(K):               # K is small & static
        p = jnp.dot(adj_vmem[...], x_b16, preferred_element_type=jnp.float32)
        x = (1.0 - alpha) * p + ah
        if step + 1 < K:
            x_b16 = x.astype(jnp.bfloat16)
    o_ref[...] = x.astype(o_ref.dtype)


# ----------------------------------------------------------------------------
# Kernel 2b: one blocked APPNP step (fallback for graphs too big for VMEM)
#   out = (1 - alpha) * (adj @ x) + alpha * h      (adj, x bf16; acc / h f32)
# ----------------------------------------------------------------------------
def _appnp_step_kernel(adj_ref, x_ref, h_ref, o_ref, acc_ref, *, alpha):
    k = pl.program_id(2)

    @pl.when(k == 0)
    def _():
        acc_ref[...] = jnp.zeros_like(acc_ref)

    acc_ref[...] += jnp.dot(adj_ref[...], x_ref[...],
                            preferred_element_type=jnp.float32)

    @pl.when(k == pl.num_programs(2) - 1)
    def _():
        o_ref[...] = ((1.0 - alpha) * acc_ref[...]
                      + alpha * h_ref[...]).astype(o_ref.dtype)


def _appnp_step_blocked(adj_b16, x_b16, h_f32, alpha, tm, tn, tk, out_dtype):
    Np_, _ = adj_b16.shape
    _, Cp = x_b16.shape
    kernel = functools.partial(_appnp_step_kernel, alpha=float(alpha))
    return pl.pallas_call(
        kernel,
        out_shape=jax.ShapeDtypeStruct((Np_, Cp), out_dtype),
        grid_spec=pltpu.PrefetchScalarGridSpec(
            num_scalar_prefetch=0,
            grid=(Np_ // tm, Cp // tn, Np_ // tk),
            in_specs=[
                pl.BlockSpec((tm, tk), lambda i, j, k: (i, k)),   # adj (bf16)
                pl.BlockSpec((tk, tn), lambda i, j, k: (k, j)),   # x   (bf16)
                pl.BlockSpec((tm, tn), lambda i, j, k: (i, j)),   # h   (f32)
            ],
            out_specs=pl.BlockSpec((tm, tn), lambda i, j, k: (i, j)),
            scratch_shapes=[pltpu.VMEM((tm, tn), jnp.float32)],
        ),
        compiler_params=pltpu.CompilerParams(
            dimension_semantics=("parallel", "parallel", "arbitrary"),
            vmem_limit_bytes=_VMEM_BUDGET_BYTES),
    )(adj_b16, x_b16, h_f32)


def appnp_propagate_padded(adj, h_p, *, K, alpha, force_blocked=False):
    """APPNP on padded activations: h = h_p; x = (1-a)*adj@x + a*h, K times.

    adj is the unpadded [N, N] normalized adjacency; h_p is the padded
    [Np, Cp] f32 output of the last linear layer.  Returns padded [Np, Cp] f32.
    """
    N = adj.shape[0]
    Np_, Cp = h_p.shape
    assert adj.shape == (N, N) and Np_ == _round_up(N, 128)

    if K == 0:
        return h_p

    adj_b16 = _pad2(adj, Np_, Np_).astype(jnp.bfloat16)

    # Single-buffered adj scratch + a handful of [Np, Cp] f32 temporaries.
    fused_vmem = Np_ * Np_ * 2 + 16 * Np_ * Cp * 4
    use_fused = (not force_blocked) and fused_vmem <= _VMEM_BUDGET_BYTES
    # On 2-TensorCore parts the fused path runs on a single core; for very
    # small K the blocked path's parallel row axis (both cores) can win.
    # TODO(synk): restructure the fused path with a core-parallel row axis
    # instead of falling back to the blocked kernel here.
    if use_fused and _NUM_TENSORCORES >= 2 and K <= 2 and Np_ >= 1024:
        use_fused = False

    if use_fused:
        kernel = functools.partial(_appnp_fused_kernel, K=int(K),
                                   alpha=float(alpha))
        return pl.pallas_call(
            kernel,
            out_shape=jax.ShapeDtypeStruct((Np_, Cp), jnp.float32),
            grid_spec=pltpu.PrefetchScalarGridSpec(
                num_scalar_prefetch=0,
                grid=(1,),
                in_specs=[pl.BlockSpec(memory_space=pl.ANY),         # adj (HBM)
                          pl.BlockSpec((Np_, Cp), lambda i: (0, 0))],
                out_specs=pl.BlockSpec((Np_, Cp), lambda i: (0, 0)),
                scratch_shapes=[pltpu.VMEM((Np_, Np_), jnp.bfloat16),
                                pltpu.SemaphoreType.DMA(())],
            ),
            compiler_params=pltpu.CompilerParams(
                dimension_semantics=("arbitrary",),
                vmem_limit_bytes=_VMEM_BUDGET_BYTES),
        )(adj_b16, h_p)

    # Blocked fallback: adj is re-streamed from HBM once per step.
    tm = _choose_tile(Np_, 512 if _PREFER_MULTI_BLOCK else 1024,
                      _PREFER_MULTI_BLOCK)
    tk = _choose_tile(Np_, 1024, False)
    # Whole feature dim in one output tile -> adj row-slab fetched once/step.
    tn = Cp if Cp <= 1024 else _choose_tile(Cp, 512, False)
    cur = h_p.astype(jnp.bfloat16)
    out = h_p
    for step in range(K):
        out_dtype = jnp.float32 if step == K - 1 else jnp.bfloat16
        out = _appnp_step_blocked(adj_b16, cur, h_p, alpha, tm, tn, tk,
                                  out_dtype)
        if step + 1 < K:
            cur = out                   # bf16, feeds next step's matmul directly
    return out


# ----------------------------------------------------------------------------
# APPNPNet forward (inference mode; params as a pytree of plain arrays)
# ----------------------------------------------------------------------------
def appnp_net_forward(params, x, adj, *, K, alpha, force_blocked_prop=False):
    eps = 1e-5
    lins, bns = params["lins"], params["bns"]

    M, C_in = x.shape
    Mp = _round_up(M, 128)

    # Pad + cast node features once; activations stay padded bf16 between
    # layers (no slice / re-pad / re-cast HBM round-trips).
    h = _pad2(x, Mp, _round_up(C_in, 128)).astype(jnp.bfloat16)

    for (w, b), (gamma, beta, rmean, rvar) in zip(lins[:-1], bns):
        scale = gamma / jnp.sqrt(rvar + eps)
        w_eff = w * scale[None, :]              # fold BN scale into the weights
        shift = beta + (b - rmean) * scale      # fold bias + BN shift together
        Kp, Np_ = _round_up(w.shape[0], 128), _round_up(w.shape[1], 128)
        w_p = _pad2(w_eff, Kp, Np_).astype(jnp.bfloat16)
        s_p = jnp.pad(shift.astype(jnp.float32),
                      (0, Np_ - w.shape[1])).reshape(1, Np_)
        h = linear_bias_act_padded(h, w_p, s_p, apply_relu=True,
                                   out_dtype=jnp.bfloat16)
        # TODO(synk): training-mode dropout / BN batch statistics not
        # implemented (eval semantics: F.dropout(training=False) is identity).

    w, b = lins[-1]
    C_out = w.shape[1]
    Kp, Cp = _round_up(w.shape[0], 128), _round_up(C_out, 128)
    w_p = _pad2(w, Kp, Cp).astype(jnp.bfloat16)
    s_p = jnp.pad(b.astype(jnp.float32), (0, Cp - C_out)).reshape(1, Cp)
    # Final pre-propagation activation in f32: it is the APPNP residual.
    h = linear_bias_act_padded(h, w_p, s_p, apply_relu=False,
                               out_dtype=jnp.float32)

    out = appnp_propagate_padded(adj, h, K=K, alpha=alpha,
                                 force_blocked=force_blocked_prop)
    return out[:M, :C_out]


# ----------------------------------------------------------------------------
# Pure-JAX f32 reference for verification
# ----------------------------------------------------------------------------
def appnp_net_reference(params, x, adj, *, K, alpha):
    eps = 1e-5
    lins, bns = params["lins"], params["bns"]
    for (w, b), (gamma, beta, rmean, rvar) in zip(lins[:-1], bns):
        x = x @ w + b
        x = (x - rmean) / jnp.sqrt(rvar + eps) * gamma + beta
        x = jnp.maximum(x, 0.0)
    w, b = lins[-1]
    x = x @ w + b
    h = x
    for _ in range(K):
        x = (1.0 - alpha) * (adj @ x) + alpha * h
    return x


# ----------------------------------------------------------------------------
# Deterministic parameter / input construction
# ----------------------------------------------------------------------------
def init_params(key, in_channels, hidden_channels, out_channels, num_layers):
    dims = ([in_channels] + [hidden_channels] * (num_layers - 1)
            + [out_channels])
    lins, bns = [], []
    for li in range(num_layers):
        fan_in, fan_out = dims[li], dims[li + 1]
        key, kw, kb = jax.random.split(key, 3)
        bound = 1.0 / jnp.sqrt(jnp.float32(fan_in))
        # stored as [in, out] so the kernel computes x @ w directly
        w = jax.random.uniform(kw, (fan_in, fan_out), jnp.float32,
                               -bound, bound)
        b = jax.random.uniform(kb, (fan_out,), jnp.float32, -bound, bound)
        lins.append((w, b))
        if li < num_layers - 1:
            key, kg, kbeta, km, kv = jax.random.split(key, 5)
            gamma = 1.0 + 0.1 * jax.random.normal(kg, (fan_out,), jnp.float32)
            beta = 0.1 * jax.random.normal(kbeta, (fan_out,), jnp.float32)
            rmean = 0.1 * jax.random.normal(km, (fan_out,), jnp.float32)
            rvar = jnp.abs(1.0 + 0.1 * jax.random.normal(kv, (fan_out,),
                                                         jnp.float32))
            bns.append((gamma, beta, rmean, rvar))
    return {"lins": lins, "bns": bns}


def make_normalized_adj(key, n):
    # random symmetric adjacency + self loops, sym-normalized (GCN style)
    a = (jax.random.uniform(key, (n, n)) < 0.05).astype(jnp.float32)
    a = jnp.maximum(a, a.T)
    a = a + jnp.eye(n, dtype=jnp.float32)
    deg = a.sum(axis=1)
    dinv = 1.0 / jnp.sqrt(deg)
    return a * dinv[:, None] * dinv[None, :]


if __name__ == "__main__":
    # small, tile-friendly shapes
    N_NODES = 256
    IN_CH, HID_CH, OUT_CH = 128, 128, 128
    NUM_LAYERS = 3
    K_PROP, ALPHA, DROPOUT = 3, 0.1, 0.5  # dropout unused in eval mode

    key = jax.random.PRNGKey(0)
    kp, kx, ka, k1, k2, k3 = jax.random.split(key, 6)

    params = init_params(kp, IN_CH, HID_CH, OUT_CH, NUM_LAYERS)
    x = jax.random.normal(kx, (N_NODES, IN_CH), jnp.float32)
    adj = make_normalized_adj(ka, N_NODES)

    ref = jax.block_until_ready(
        appnp_net_reference(params, x, adj, K=K_PROP, alpha=ALPHA))

    # Main path: fused APPNP propagation (adj resident in VMEM).
    out = jax.block_until_ready(
        appnp_net_forward(params, x, adj, K=K_PROP, alpha=ALPHA))
    assert out.shape == (N_NODES, OUT_CH)
    assert jnp.allclose(out, ref, atol=5e-2, rtol=5e-2), \
        "fused-propagation mismatch vs reference"

    # Also exercise the blocked (large-graph) propagation path.
    out_b = jax.block_until_ready(
        appnp_net_forward(params, x, adj, K=K_PROP, alpha=ALPHA,
                          force_blocked_prop=True))
    assert jnp.allclose(out_b, ref, atol=5e-2, rtol=5e-2), \
        "blocked-propagation mismatch vs reference"

    # Exercise the padding path with ogbn-proteins-like non-aligned dims.
    xq = jax.random.normal(k1, (50, 8), jnp.float32)
    wq = 0.3 * jax.random.normal(k2, (8, 112), jnp.float32)
    bq = 0.1 * jax.random.normal(k3, (112,), jnp.float32)
    yq = jax.block_until_ready(linear_bias_act(xq, wq, bq, apply_relu=True))
    yref = jnp.maximum(xq @ wq + bq, 0.0)
    assert yq.shape == (50, 112)
    assert jnp.allclose(yq, yref, atol=3e-2, rtol=3e-2), \
        "padded linear mismatch vs reference"

    print("KERNEL_OK")
</pallas_src>

<mosaic_0001>
module attributes {stable_mosaic.version = 11 : i64} {
  func.func @_linear_kernel(%arg0: i32, %arg1: i32, %arg2: memref<256x128xbf16, #tpu.memory_space<vmem>>, %arg3: memref<128x128xbf16, #tpu.memory_space<vmem>>, %arg4: memref<1x128xf32, #tpu.memory_space<vmem>>, %arg5: memref<256x128xbf16, #tpu.memory_space<vmem>>) attributes {dimension_semantics = [#tpu.dimension_semantics<parallel>, #tpu.dimension_semantics<parallel>], iteration_bounds = array<i64: 1, 1>, scalar_prefetch = 0 : i64, scratch_operands = 0 : i64, tpu.core_type = #tpu.core_type<tc>, window_params = [{transform_indices = @transform_0, window_bounds = array<i64: 256, 128>}, {transform_indices = @transform_1, window_bounds = array<i64: 128, 128>}, {transform_indices = @transform_2, window_bounds = array<i64: 1, 128>}, {transform_indices = @transform_3, window_bounds = array<i64: 256, 128>}]} {
    %c0 = arith.constant 0 : index
    %c0_0 = arith.constant 0 : index
    %0 = vector.load %arg2[%c0, %c0_0] : memref<256x128xbf16, #tpu.memory_space<vmem>>, vector<256x128xbf16>
    %c0_1 = arith.constant 0 : index
    %c0_2 = arith.constant 0 : index
    %1 = vector.load %arg3[%c0_1, %c0_2] : memref<128x128xbf16, #tpu.memory_space<vmem>>, vector<128x128xbf16>
    %cst = arith.constant dense<0.000000e+00> : vector<256x128xf32>
    %2 = tpu.matmul %0, %1, %cst {dimension_numbers = #tpu.dot_dimension_numbers<[1], [0], [0], [1], [0, 0, 1, 1], [], []>} : vector<256x128xbf16>, vector<128x128xbf16>, vector<256x128xf32> -> vector<256x128xf32>
    %c0_3 = arith.constant 0 : index
    %c0_4 = arith.constant 0 : index
    %3 = vector.load %arg4[%c0_3, %c0_4] : memref<1x128xf32, #tpu.memory_space<vmem>>, vector<1x128xf32>
    %4 = vector.broadcast %3 : vector<1x128xf32> to vector<256x128xf32>
    %5 = arith.addf %2, %4 : vector<256x128xf32>
    %cst_5 = arith.constant 0.000000e+00 : f32
    %6 = vector.broadcast %cst_5 : f32 to vector<256x128xf32>
    %7 = arith.maximumf %5, %6 : vector<256x128xf32>
    %8 = arith.truncf %7 : vector<256x128xf32> to vector<256x128xbf16>
    %c0_6 = arith.constant 0 : index
    %c0_7 = arith.constant 0 : index
    %9 = vector.load %arg5[%c0_6, %c0_7] : memref<256x128xbf16, #tpu.memory_space<vmem>>, vector<256x128xbf16>
    tpu.vector_store %arg5[%c0_6, %c0_7], %8 {strides = array<i32>} : memref<256x128xbf16, #tpu.memory_space<vmem>>, vector<256x128xbf16>,
    return
  }
  func.func @transform_0(%arg0: i32, %arg1: i32) -> (i32, i32) {
    %c0_i32 = arith.constant 0 : i32
    %c0_i32_0 = arith.constant 0 : i32
    return %arg0, %c0_i32 : i32, i32
  }
  func.func @transform_1(%arg0: i32, %arg1: i32) -> (i32, i32) {
    %c0_i32 = arith.constant 0 : i32
    %c0_i32_0 = arith.constant 0 : i32
    return %c0_i32, %arg1 : i32, i32
  }
  func.func @transform_2(%arg0: i32, %arg1: i32) -> (i32, i32) {
    %c0_i32 = arith.constant 0 : i32
    %c0_i32_0 = arith.constant 0 : i32
    return %c0_i32, %arg1 : i32, i32
  }
  func.func @transform_3(%arg0: i32, %arg1: i32) -> (i32, i32) {
    %c0_i32 = arith.constant 0 : i32
    return %arg0, %arg1 : i32, i32
  }
}

</mosaic_0001>

<bundles_post_ra>
// kernel: tpu_custom_call.1
= control target key start
LH: loop header
LB: loop body
LE: loop exit
PB: predicated region body
PF: predicated region fallthrough
CT: control target
= control target key end

     0   :  { %8 = vsyncpa [#allocation3], 0  ;;  %s1094_s0 = inlined_call_operand.hbm [shape: bf16[256,128], index: 0, kind: input, shape index: {}]   ;;  %s1095_s1 = inlined_call_operand.hbm [shape: bf16[128,128], index: 1, kind: input, shape index: {}]   ;;  %s1096_s2 = inlined_call_operand.vmem [shape: f32[1,128], index: 2, kind: input, shape index: {}]   ;;  %s1097_s3 = inlined_call_operand.hbm [shape: bf16[256,128], index: 3, kind: output, shape index: {}]  }
   0x1   :  { %9 = vsyncpa [#allocation6], 0 }
   0x2   :  { %10 = vsyncpa [#allocation4], 0  ;;  %s987_s12 = smov [#allocation2]   ;;  %s915_s16 = scalar_lea.hbm %s1094_s0, 2048 }
   0x3   :  { %s16_s13 = sshll.u32 %s987_s12, 4  ;;  %p916_p0 = scmp.ne.s32.totalorder %s1094_s0, %s915_s16  ;;  %s17_s13 = int_to_ptr.vmem [resolvable:$true] %s16_s13 }
   0x4   :  { %p919_p1 = scmp.lt.u32.totalorder %s915_s16, %s1094_s0 }
   0x6   :  { %p921_p2 = pnand %p919_p1, %p916_p0 }
   0x8   :  { %924 = shalt.err (!%p921_p2)
}
   0x9   :  { %s925_s21 = scalar_lea.vmem %s17_s13, 2048  ;;  %p930_p4 = scmp.lt.s32.totalorder %s17_s13, %s17_s13 }
   0xa   :  { %p926_p3 = scmp.ne.s32.totalorder %s17_s13, %s925_s21  ;;  %p931_p5 = scmp.lt.s32.totalorder %s925_s21, %s925_s21 }
   0xc   :  { %p932_p6 = por %p931_p5, %p930_p4 }
   0xe   :  { %p933_p7 = pnand %p932_p6, %p926_p3 }
  0x10   :  { %936 = shalt.err (!%p933_p7)
}
  0x11   :  { %s988_s22 = smov 64   ;;  %s989_s23 = smov 4  }
  0x12   :  { %22 = dma.hbm_to_vmem [thread:$0]  %s1094_s0, 2048, %s17_s13, [#allocation3], %s988_s22, %s988_s22, %s989_s23  }
  0x13   :  { %s990_s26 = smov [#allocation5]   ;;  %s937_s30 = scalar_lea.hbm %s1095_s1, 1024 }
  0x14   :  { %s28_s27 = sshll.u32 %s990_s26, 4  ;;  %p938_p8 = scmp.ne.s32.totalorder %s1095_s1, %s937_s30  ;;  %s29_s27 = int_to_ptr.vmem [resolvable:$true] %s28_s27 }
  0x15   :  { %p941_p9 = scmp.lt.u32.totalorder %s937_s30, %s1095_s1 }
  0x17   :  { %p943_p10 = pnand %p941_p9, %p938_p8 }
  0x19   :  { %946 = shalt.err (!%p943_p10)
}
  0x1a   :  { %s947_s8 = scalar_lea.vmem %s29_s27, 1024  ;;  %p952_p12 = scmp.lt.s32.totalorder %s29_s27, %s29_s27 }
  0x1b   :  { %p948_p11 = scmp.ne.s32.totalorder %s29_s27, %s947_s8  ;;  %p953_p13 = scmp.lt.s32.totalorder %s947_s8, %s947_s8 }
  0x1d   :  { %p954_p0 = por %p953_p13, %p952_p12 }
  0x1f   :  { %p955_p1 = pnand %p954_p0, %p948_p11 }
  0x21   :  { %958 = shalt.err (!%p955_p1)
}
  0x22   :  { %34 = dma.hbm_to_vmem [thread:$0]  %s1095_s1, 1024, %s29_s27, [#allocation6], %s988_s22, %s988_s22, %s989_s23  }
  0x23   :  { %981 = dma.done.wait [#allocation3], 2048  }
  0x24   :  { %982 = vsyncadd [#allocation3], 4294965248 }
  0x25   :  { %983 = dma.done.wait [#allocation6], 1024  }
  0x26   :  { %984 = vsyncadd [#allocation6], 4294966272  ;;  %v891_v0 = vld [vmem:[#allocation5] sm:$0xff]   ;;  %v892_v1 = vld [vmem:[#allocation5 + $0x8] sm:$0xff]  }
  0x27   :  { %822 = vmatprep.subr.bf16.mxu0 %v891_v0  ;;  %870 = vmatprep.subr.bf16.mxu1 %v891_v0  ;;  %v893_v2 = vld [vmem:[#allocation5 + $0x10] sm:$0xff]   ;;  %v894_v3 = vld [vmem:[#allocation5 + $0x18] sm:$0xff]   ;;  %v899_v4 = vld [vmem:[#allocation2] sm:$0xff]  }
  0x28   :  { %823 = vmatpush3.bf16.msra.mxu0 %v891_v0  ;;  %878 = vmatpush3.bf16.msra.mxu1 %v891_v0  ;;  %v900_v5 = vld [vmem:[#allocation2 + $0x40] sm:$0xff]   ;;  %v896_v7 = vld [vmem:[#allocation5 + $0x28] sm:$0xff]   ;;  %v897_v8 = vld [vmem:[#allocation5 + $0x30] sm:$0xff]  }
  0x29   :  { %824 = vmatprep.subr.bf16.mxu0 %v892_v1  ;;  %871 = vmatprep.subr.bf16.mxu1 %v892_v1  ;;  %v895_v6 = vld [vmem:[#allocation5 + $0x20] sm:$0xff]   ;;  %v898_v9 = vld [vmem:[#allocation5 + $0x38] sm:$0xff]   ;;  %v901_v10 = vld [vmem:[#allocation2 + $0x8] sm:$0xff]  }
  0x2a   :  { %838 = vmatprep.mubr.bf16.mxu0 %v899_v4  ;;  %854 = vmatprep.mubr.bf16.mxu1 %v900_v5  ;;  %v902_v11 = vld [vmem:[#allocation2 + $0x48] sm:$0xff]   ;;  %v903_v12 = vld [vmem:[#allocation2 + $0x10] sm:$0xff]   ;;  %v905_v14 = vld [vmem:[#allocation2 + $0x18] sm:$0xff]  }
  0x2b   :  { %v904_v13 = vld [vmem:[#allocation2 + $0x50] sm:$0xff]   ;;  %v906_v15 = vld [vmem:[#allocation2 + $0x58] sm:$0xff]   ;;  %v907_v16 = vld [vmem:[#allocation2 + $0x20] sm:$0xff]  }
  0x2c   :  { %825 = vmatpush3.bf16.msra.mxu0 %v892_v1  ;;  %879 = vmatpush3.bf16.msra.mxu1 %v892_v1  ;;  %v908_v17 = vld [vmem:[#allocation2 + $0x60] sm:$0xff]   ;;  %v909_v18 = vld [vmem:[#allocation2 + $0x28] sm:$0xff]   ;;  %v911_v20 = vld [vmem:[#allocation2 + $0x30] sm:$0xff]  }
  0x2d   :  { %826 = vmatprep.subr.bf16.mxu0 %v893_v2  ;;  %872 = vmatprep.subr.bf16.mxu1 %v893_v2  ;;  %v910_v19 = vld [vmem:[#allocation2 + $0x68] sm:$0xff]   ;;  %v912_v21 = vld [vmem:[#allocation2 + $0x70] sm:$0xff]   ;;  %v913_v22 = vld [vmem:[#allocation2 + $0x38] sm:$0xff]  }
  0x2e   :  { %v914_v23 = vld [vmem:[#allocation2 + $0x78] sm:$0xff]   ;;  %v1045_v24 = vld [vmem:[%s1096_s2] ss:$0 sm:$0xff]  ;;  %s991_s2 = smov [#allocation7]  }
  0x2f   :  { %s601_s11 = sshll.u32 %s991_s2, 4  ;;  %s602_s11 = int_to_ptr.vmem [resolvable:$true] %s601_s11 }
  0x30   :  { %827 = vmatpush3.bf16.msra.mxu0 %v893_v2  ;;  %880 = vmatpush3.bf16.msra.mxu1 %v893_v2  ;;  %s959_s12 = scalar_lea.vmem %s602_s11, 2048  ;;  %p964_p3 = scmp.lt.s32.totalorder %s602_s11, %s602_s11 }
  0x31   :  { %828 = vmatprep.subr.bf16.mxu0 %v894_v3  ;;  %873 = vmatprep.subr.bf16.mxu1 %v894_v3  ;;  %p960_p2 = scmp.ne.s32.totalorder %s602_s11, %s959_s12  ;;  %p965_p4 = scmp.lt.s32.totalorder %s959_s12, %s959_s12 }
  0x33   :  { %p966_p5 = por %p965_p4, %p964_p3 }
  0x34   :  { %829 = vmatpush3.bf16.msra.mxu0 %v894_v3  ;;  %881 = vmatpush3.bf16.msra.mxu1 %v894_v3 }
  0x35   :  { %830 = vmatprep.subr.bf16.mxu0 %v895_v6  ;;  %874 = vmatprep.subr.bf16.mxu1 %v895_v6  ;;  %p967_p6 = pnand %p966_p5, %p960_p2 }
  0x38   :  { %831 = vmatpush3.bf16.msra.mxu0 %v895_v6  ;;  %882 = vmatpush3.bf16.msra.mxu1 %v895_v6 }
  0x39   :  { %832 = vmatprep.subr.bf16.mxu0 %v896_v7  ;;  %875 = vmatprep.subr.bf16.mxu1 %v896_v7 }
  0x3c   :  { %833 = vmatpush3.bf16.msra.mxu0 %v896_v7  ;;  %883 = vmatpush3.bf16.msra.mxu1 %v896_v7 }
  0x3d   :  { %834 = vmatprep.subr.bf16.mxu0 %v897_v8  ;;  %876 = vmatprep.subr.bf16.mxu1 %v897_v8 }
  0x40   :  { %835 = vmatpush3.bf16.msra.mxu0 %v897_v8  ;;  %884 = vmatpush3.bf16.msra.mxu1 %v897_v8 }
  0x41   :  { %836 = vmatprep.subr.bf16.mxu0 %v898_v9  ;;  %877 = vmatprep.subr.bf16.mxu1 %v898_v9 }
  0x44   :  { %837 = vmatpush3.bf16.msra.mxu0 %v898_v9  ;;  %885 = vmatpush3.bf16.msra.mxu1 %v898_v9 }
  0x47   :  { %839 = vmatmul.mubr.bf16.vlgmr.msra.gmra.mrb[0].mxu0 %v901_v10  ;;  %855 = vmatmul.mubr.bf16.vlgmr.msra.gmra.mrb[0].mxu1 %v902_v11 }
  0x48   :  { %842 = vmatprep.mubr.bf16.mxu0 %v903_v12  ;;  %858 = vmatprep.mubr.bf16.mxu1 %v904_v13 }
  0x4f   :  { %843 = vmatmul.mubr.bf16.gmra.mrb[4].mxu0 %v905_v14  ;;  %859 = vmatmul.mubr.bf16.gmra.mrb[4].mxu1 %v906_v15 }
  0x50   :  { %846 = vmatprep.mubr.bf16.mxu0 %v907_v16  ;;  %862 = vmatprep.mubr.bf16.mxu1 %v908_v17 }
  0x57   :  { %847 = vmatmul.mubr.bf16.gmra.mrb[8].mxu0 %v909_v18  ;;  %863 = vmatmul.mubr.bf16.gmra.mrb[8].mxu1 %v910_v19 }
  0x58   :  { %850 = vmatprep.mubr.bf16.mxu0 %v911_v20  ;;  %866 = vmatprep.mubr.bf16.mxu1 %v912_v21 }
  0x5f   :  { %851 = vmatmul.mubr.bf16.gmra.mrb[12].mxu0 %v913_v22  ;;  %867 = vmatmul.mubr.bf16.gmra.mrb[12].mxu1 %v914_v23 }
 0x11a   :  { %v840_v25 = vpop.f32.mrb[0].mxu0  ;;  %v856_v26 = vpop.f32.mrb[0].mxu1 }
 0x11b   :  { %v286_v27 = vadd.f32 %v840_v25, %v1045_v24  ;;  %v350_v28 = vadd.f32 %v856_v26, %v1045_v24  ;;  %v277_v29 = vpop.f32.mrb[1].mxu0  ;;  %v341_v30 = vpop.f32.mrb[1].mxu1 }
 0x11c   :  { %v278_v31 = vadd.f32 %v1045_v24, %v277_v29  ;;  %v342_v32 = vadd.f32 %v1045_v24, %v341_v30  ;;  %v841_v33 = vpop.f32.mrb[2].mxu0  ;;  %v857_v34 = vpop.f32.mrb[2].mxu1 }
 0x11d   :  { %v289_v35 = vadd.f32 %v841_v33, %v1045_v24  ;;  %v353_v36 = vadd.f32 %v857_v34, %v1045_v24  ;;  %v280_v37 = vpop.f32.mrb[3].mxu0  ;;  %v344_v38 = vpop.f32.mrb[3].mxu1  ;;  %v406_v41 = vmax.f32 %v286_v27, 0.0  ;;  %v422_v42 = vmax.f32 %v350_v28, 0.0 }
 0x11e   :  { %v281_v39 = vadd.f32 %v1045_v24, %v280_v37  ;;  %v345_v40 = vadd.f32 %v1045_v24, %v344_v38  ;;  %v404_v45 = vmax.f32 %v278_v31, 0.0  ;;  %v420_v46 = vmax.f32 %v342_v32, 0.0 }
 0x11f   :  { %v407_v43 = vmax.f32 %v289_v35, 0.0  ;;  %v423_v44 = vmax.f32 %v353_v36, 0.0 }
 0x120   :  { %v405_v47 = vmax.f32 %v281_v39, 0.0  ;;  %v421_v48 = vmax.f32 %v345_v40, 0.0 }
 0x121   :  { %v711_v49 = vpack.c.bf16 %v407_v43, %v406_v41  ;;  %v751_v50 = vpack.c.bf16 %v423_v44, %v422_v42 }
 0x122   :  { %v706_v51 = vpack.c.bf16 %v405_v47, %v404_v45  ;;  %v746_v52 = vpack.c.bf16 %v421_v48, %v420_v46  ;;  %v844_v53 = vpop.f32.mrb[4].mxu0  ;;  %v860_v54 = vpop.f32.mrb[4].mxu1 }
 0x123   :  { %783 = vst [vmem:[#allocation7 + $0x8] sm:$0xff] %v711_v49   ;;  %791 = vst [vmem:[#allocation7 + $0x48] sm:$0xff] %v751_v50   ;;  %v302_v55 = vadd.f32 %v844_v53, %v1045_v24  ;;  %v366_v56 = vadd.f32 %v860_v54, %v1045_v24  ;;  %v293_v57 = vpop.f32.mrb[5].mxu0  ;;  %v357_v58 = vpop.f32.mrb[5].mxu1 }
 0x124   :  { %707 = vst [vmem:[#allocation7] sm:$0xff] %v706_v51   ;;  %790 = vst [vmem:[#allocation7 + $0x40] sm:$0xff] %v746_v52   ;;  %v294_v59 = vadd.f32 %v1045_v24, %v293_v57  ;;  %v358_v60 = vadd.f32 %v1045_v24, %v357_v58  ;;  %v845_v61 = vpop.f32.mrb[6].mxu0  ;;  %v861_v62 = vpop.f32.mrb[6].mxu1 }
 0x125   :  { %v305_v63 = vadd.f32 %v845_v61, %v1045_v24  ;;  %v369_v0 = vadd.f32 %v861_v62, %v1045_v24  ;;  %v296_v1 = vpop.f32.mrb[7].mxu0  ;;  %v360_v2 = vpop.f32.mrb[7].mxu1  ;;  %v410_v5 = vmax.f32 %v302_v55, 0.0  ;;  %v426_v6 = vmax.f32 %v366_v56, 0.0 }
 0x126   :  { %v297_v3 = vadd.f32 %v1045_v24, %v296_v1  ;;  %v361_v4 = vadd.f32 %v1045_v24, %v360_v2  ;;  %v408_v9 = vmax.f32 %v294_v59, 0.0  ;;  %v424_v10 = vmax.f32 %v358_v60, 0.0 }
 0x127   :  { %v411_v7 = vmax.f32 %v305_v63, 0.0  ;;  %v427_v8 = vmax.f32 %v369_v0, 0.0 }
 0x128   :  { %v409_v11 = vmax.f32 %v297_v3, 0.0  ;;  %v425_v12 = vmax.f32 %v361_v4, 0.0 }
 0x129   :  { %v721_v13 = vpack.c.bf16 %v411_v7, %v410_v5  ;;  %v761_v14 = vpack.c.bf16 %v427_v8, %v426_v6 }
 0x12a   :  { %v716_v15 = vpack.c.bf16 %v409_v11, %v408_v9  ;;  %v756_v16 = vpack.c.bf16 %v425_v12, %v424_v10  ;;  %v848_v17 = vpop.f32.mrb[8].mxu0  ;;  %v864_v18 = vpop.f32.mrb[8].mxu1 }
 0x12b   :  { %785 = vst [vmem:[#allocation7 + $0x18] sm:$0xff] %v721_v13   ;;  %793 = vst [vmem:[#allocation7 + $0x58] sm:$0xff] %v761_v14   ;;  %v318_v19 = vadd.f32 %v848_v17, %v1045_v24  ;;  %v382_v20 = vadd.f32 %v864_v18, %v1045_v24  ;;  %v309_v21 = vpop.f32.mrb[9].mxu0  ;;  %v373_v22 = vpop.f32.mrb[9].mxu1 }
 0x12c   :  { %784 = vst [vmem:[#allocation7 + $0x10] sm:$0xff] %v716_v15   ;;  %792 = vst [vmem:[#allocation7 + $0x50] sm:$0xff] %v756_v16   ;;  %v310_v23 = vadd.f32 %v1045_v24, %v309_v21  ;;  %v374_v25 = vadd.f32 %v1045_v24, %v373_v22  ;;  %v849_v26 = vpop.f32.mrb[10].mxu0  ;;  %v865_v27 = vpop.f32.mrb[10].mxu1 }
 0x12d   :  { %v321_v28 = vadd.f32 %v849_v26, %v1045_v24  ;;  %v385_v29 = vadd.f32 %v865_v27, %v1045_v24  ;;  %v312_v30 = vpop.f32.mrb[11].mxu0  ;;  %v376_v31 = vpop.f32.mrb[11].mxu1  ;;  %v414_v34 = vmax.f32 %v318_v19, 0.0  ;;  %v430_v35 = vmax.f32 %v382_v20, 0.0 }
 0x12e   :  { %v313_v32 = vadd.f32 %v1045_v24, %v312_v30  ;;  %v377_v33 = vadd.f32 %v1045_v24, %v376_v31  ;;  %v412_v38 = vmax.f32 %v310_v23, 0.0  ;;  %v428_v39 = vmax.f32 %v374_v25, 0.0 }
 0x12f   :  { %v415_v36 = vmax.f32 %v321_v28, 0.0  ;;  %v431_v37 = vmax.f32 %v385_v29, 0.0 }
 0x130   :  { %v413_v40 = vmax.f32 %v313_v32, 0.0  ;;  %v429_v41 = vmax.f32 %v377_v33, 0.0 }
 0x131   :  { %v731_v42 = vpack.c.bf16 %v415_v36, %v414_v34  ;;  %v771_v43 = vpack.c.bf16 %v431_v37, %v430_v35 }
 0x132   :  { %v726_v44 = vpack.c.bf16 %v413_v40, %v412_v38  ;;  %v766_v45 = vpack.c.bf16 %v429_v41, %v428_v39  ;;  %v852_v46 = vpop.f32.mrb[12].mxu0  ;;  %v868_v47 = vpop.f32.mrb[12].mxu1 }
 0x133   :  { %787 = vst [vmem:[#allocation7 + $0x28] sm:$0xff] %v731_v42   ;;  %795 = vst [vmem:[#allocation7 + $0x68] sm:$0xff] %v771_v43   ;;  %v334_v48 = vadd.f32 %v852_v46, %v1045_v24  ;;  %v398_v49 = vadd.f32 %v868_v47, %v1045_v24  ;;  %v325_v50 = vpop.f32.mrb[13].mxu0  ;;  %v389_v51 = vpop.f32.mrb[13].mxu1 }
 0x134   :  { %786 = vst [vmem:[#allocation7 + $0x20] sm:$0xff] %v726_v44   ;;  %794 = vst [vmem:[#allocation7 + $0x60] sm:$0xff] %v766_v45   ;;  %v326_v52 = vadd.f32 %v1045_v24, %v325_v50  ;;  %v390_v53 = vadd.f32 %v1045_v24, %v389_v51  ;;  %v853_v54 = vpop.f32.mrb[14].mxu0  ;;  %v869_v55 = vpop.f32.mrb[14].mxu1 }
 0x135   :  { %v337_v56 = vadd.f32 %v853_v54, %v1045_v24  ;;  %v401_v57 = vadd.f32 %v869_v55, %v1045_v24  ;;  %v328_v58 = vpop.f32.mrb[15].mxu0  ;;  %v392_v59 = vpop.f32.mrb[15].mxu1  ;;  %v418_v62 = vmax.f32 %v334_v48, 0.0  ;;  %v434_v63 = vmax.f32 %v398_v49, 0.0 }
 0x136   :  { %v329_v60 = vadd.f32 %v1045_v24, %v328_v58  ;;  %v393_v61 = vadd.f32 %v1045_v24, %v392_v59  ;;  %v416_v2 = vmax.f32 %v326_v52, 0.0  ;;  %v432_v3 = vmax.f32 %v390_v53, 0.0 }
 0x137   :  { %v419_v0 = vmax.f32 %v337_v56, 0.0  ;;  %v435_v1 = vmax.f32 %v401_v57, 0.0 }
 0x138   :  { %v417_v4 = vmax.f32 %v329_v60, 0.0  ;;  %v433_v5 = vmax.f32 %v393_v61, 0.0 }
 0x139   :  { %v741_v6 = vpack.c.bf16 %v419_v0, %v418_v62  ;;  %v781_v7 = vpack.c.bf16 %v435_v1, %v434_v63 }
 0x13a   :  { %v736_v8 = vpack.c.bf16 %v417_v4, %v416_v2  ;;  %v776_v9 = vpack.c.bf16 %v433_v5, %v432_v3 }
 0x13b   :  { %789 = vst [vmem:[#allocation7 + $0x38] sm:$0xff] %v741_v6   ;;  %797 = vst [vmem:[#allocation7 + $0x78] sm:$0xff] %v781_v7  }
 0x13c   :  { %788 = vst [vmem:[#allocation7 + $0x30] sm:$0xff] %v736_v8   ;;  %796 = vst [vmem:[#allocation7 + $0x70] sm:$0xff] %v776_v9  }
 0x13d   :  { %970 = shalt.err (!%p967_p6)
}
 0x13e   :  { %s971_s15 = scalar_lea.hbm %s1097_s3, 2048 }
 0x13f   :  { %p972_p7 = scmp.ne.s32.totalorder %s1097_s3, %s971_s15  ;;  %p975_p8 = scmp.lt.u32.totalorder %s971_s15, %s1097_s3 }
 0x141   :  { %p977_p9 = pnand %p975_p8, %p972_p7 }
 0x143   :  { %980 = shalt.err (!%p977_p9)
}
 0x144   :  { %607 = dma.vmem_to_hbm [thread:$0]  %s602_s11, 2048, %s1097_s3, [#allocation4], %s988_s22, %s988_s22, %s989_s23  }
 0x145   :  { %985 = dma.done.wait [#allocation4], 2048  }
 0x146   :  { %986 = vsyncadd [#allocation4], 4294965248 }
 0x147   :  { %611 = vsyncpa [#allocation3], 1 }
 0x148   :  { %612 = vsyncpa [#allocation6], 1 }
 0x149   :  { %613 = vsyncpa [#allocation4], 1 }

</bundles_post_ra>
